<compile_context>
chip_gen: v7x
topology: tpu7x:2x2x1
jax: 0.10.0
libtpu: 0.0.40
codegen_flags: <defaults>
</compile_context>

<pallas_src>
import math

import jax
import jax.numpy as jnp
from jax.experimental import pallas as pl
from jax.experimental.pallas import tpu as pltpu

# Conservative, generation-portable VMEM settings: 32 MiB scoped limit is <= the default
# on v6e/v7x and safely below physical VMEM everywhere; tiles are sized against a 24 MiB
# budget so double-buffered x/out tiles + the resident weight never overshoot it.
_VMEM_LIMIT_BYTES = 32 * 1024 * 1024
_VMEM_TILE_BUDGET_BYTES = 24 * 1024 * 1024


def _siren_kernel(x_ref, wT_ref, b_ref, o_ref):
    # x_ref: [TB, Din]   wT_ref: [Din, Dout] (resident)   b_ref: [1, Dout] (resident, f32)
    # MXU matmul with f32 accumulation regardless of input dtype.
    acc = jnp.dot(x_ref[...], wT_ref[...], preferred_element_type=jnp.float32)
    acc = acc + b_ref[...]          # bias already scaled by w0; broadcast [1, Dout]
    # w0 is folded into the params, so the epilogue is just sin() (EUP + VPU), in f32.
    o_ref[...] = jnp.sin(acc).astype(o_ref.dtype)


def init_siren_params(key, dim_in, dim_out, *, w0=30.0, c=6.0, is_first=False):
    """Matches the PyTorch init: weight ~ U(-w_std, w_std), bias = 0."""
    w_std = (1.0 / dim_in) if is_first else (math.sqrt(c / dim_in) / w0)
    weight = jax.random.uniform(
        key, (dim_out, dim_in), minval=-w_std, maxval=w_std, dtype=jnp.float32
    )
    bias = jnp.zeros((dim_out,), dtype=jnp.float32)
    return weight, bias


def prepare_siren_params(weight, bias, *, w0=30.0, compute_dtype=jnp.float32):
    """One-time prep: fold w0 into the params and pre-transpose the weight.

    sin(w0 * (x @ W.T + b)) == sin(x @ (w0*W).T + w0*b)
    Returns (wT [Din, Dout] in compute_dtype, bias [1, Dout] in f32).
    """
    wT = (w0 * weight).T.astype(compute_dtype)            # [Din, Dout]
    b2 = (w0 * bias).reshape(1, -1).astype(jnp.float32)   # kept f32 for the f32 epilogue
    return wT, b2


def _choose_batch_tile(batch, dim_in, dim_out, in_itemsize, out_itemsize,
                       budget_bytes=_VMEM_TILE_BUDGET_BYTES, max_tile=2048):
    # Resident tensors: weight [Din, Dout] + bias [1, Dout] (f32).
    resident = dim_in * dim_out * in_itemsize + dim_out * 4
    avail = max(budget_bytes - resident, 1 << 20)
    # Double-buffered x tile and out tile per row of the batch tile.
    per_row = 2 * (dim_in * in_itemsize + dim_out * out_itemsize)
    tb = avail // per_row
    tb = int(min(tb, max_tile, max(batch, 8)))
    tb = max(8, (tb // 8) * 8)    # second-to-last block dim must be a multiple of 8
    return tb


def siren_forward(x, wT, b2, *, block_b=None, out_dtype=None):
    """x: [B, Din]; wT: [Din, Dout] (w0 pre-folded); b2: [1, Dout] f32 (w0 pre-folded)."""
    B, Din = x.shape
    Din_w, Dout = wT.shape
    assert Din == Din_w, (Din, Din_w)
    out_dtype = out_dtype if out_dtype is not None else x.dtype

    x = x.astype(wT.dtype)  # bf16 inputs supported; accumulation stays f32 in-kernel.
    in_itemsize = jnp.dtype(wT.dtype).itemsize
    out_itemsize = jnp.dtype(out_dtype).itemsize

    if block_b is None:
        tb = _choose_batch_tile(B, Din, Dout, in_itemsize, out_itemsize)
    else:
        tb = max(8, (min(int(block_b), max(B, 8)) // 8) * 8)

    # Pad the batch to a multiple of the tile so every tile is full (garbage rows are
    # sliced off below); sin() on padded garbage is finite, so this is safe.
    n_tiles = pl.cdiv(B, tb)
    B_pad = n_tiles * tb
    if B_pad != B:
        x = jnp.pad(x, ((0, B_pad - B), (0, 0)))

    cost = pl.CostEstimate(
        flops=2 * B_pad * Din * Dout,
        transcendentals=B_pad * Dout,
        bytes_accessed=(B_pad * Din * in_itemsize
                        + Din * Dout * in_itemsize
                        + Dout * 4
                        + B_pad * Dout * out_itemsize),
    )

    # TODO(synk): if Din grows beyond ~2048 or the weight no longer fits the VMEM budget,
    # add a trailing "arbitrary" K grid axis with an f32 accumulator scratch.
    out = pl.pallas_call(
        _siren_kernel,
        out_shape=jax.ShapeDtypeStruct((B_pad, Dout), out_dtype),
        grid_spec=pltpu.PrefetchScalarGridSpec(
            num_scalar_prefetch=0,
            grid=(n_tiles,),
            in_specs=[
                pl.BlockSpec((tb, Din), lambda i: (i, 0)),       # x: tiled over batch
                pl.BlockSpec((Din, Dout), lambda i: (0, 0)),     # weight: VMEM-resident
                pl.BlockSpec((1, Dout), lambda i: (0, 0)),       # bias: VMEM-resident
            ],
            out_specs=pl.BlockSpec((tb, Dout), lambda i: (i, 0)),
        ),
        compiler_params=pltpu.CompilerParams(
            dimension_semantics=("parallel",),        # shard batch tiles across cores
            vmem_limit_bytes=_VMEM_LIMIT_BYTES,
        ),
        cost_estimate=cost,
    )(x, wT, b2)

    if B_pad != B:
        out = out[:B]
    return out


if __name__ == "__main__":
    # Small shapes consistent with the module's forward: x [batch, dim_in].
    # Dout = 128 keeps the output lane-dense (multiple of 128 -> unmasked stores).
    batch, dim_in, dim_out = 200, 16, 128
    w0, c, is_first = 30.0, 6.0, False

    key = jax.random.PRNGKey(0)
    k_w, k_x = jax.random.split(key)

    weight, bias = init_siren_params(
        k_w, dim_in, dim_out, w0=w0, c=c, is_first=is_first
    )
    x = jax.random.normal(k_x, (batch, dim_in), dtype=jnp.float32)

    # Reference in plain JAX (same semantics as PyTorch F.linear + sin(w0*x)).
    ref = jnp.sin(w0 * (x @ weight.T + bias))

    # 1) f32 path, explicit small batch tile to exercise the grid + padded last tile.
    wT32, b32 = prepare_siren_params(weight, bias, w0=w0, compute_dtype=jnp.float32)
    out32 = jax.block_until_ready(siren_forward(x, wT32, b32, block_b=64))
    assert out32.shape == (batch, dim_out)
    assert jnp.allclose(out32, ref, atol=1e-5, rtol=1e-5)

    # 2) bf16-input path (half the HBM traffic); f32 accumulation + f32 epilogue.
    wT16, b16 = prepare_siren_params(weight, bias, w0=w0, compute_dtype=jnp.bfloat16)
    out16 = jax.block_until_ready(
        siren_forward(x.astype(jnp.bfloat16), wT16, b16, out_dtype=jnp.float32)
    )
    assert out16.shape == (batch, dim_out)
    assert jnp.allclose(out16, ref, atol=5e-2, rtol=5e-2)

    print("KERNEL_OK")
</pallas_src>

<mosaic_0001>
module attributes {stable_mosaic.version = 11 : i64} {
  func.func @_siren_kernel(%arg0: i32, %arg1: memref<64x16xf32, #tpu.memory_space<vmem>>, %arg2: memref<16x128xf32, #tpu.memory_space<vmem>>, %arg3: memref<1x128xf32, #tpu.memory_space<vmem>>, %arg4: memref<64x128xf32, #tpu.memory_space<vmem>>) attributes {dimension_semantics = [#tpu.dimension_semantics<parallel>], iteration_bounds = array<i64: 4>, scalar_prefetch = 0 : i64, scratch_operands = 0 : i64, tpu.core_type = #tpu.core_type<tc>, window_params = [{transform_indices = @transform_0, window_bounds = array<i64: 64, 16>}, {pipeline_mode = #tpu.pipeline_mode<synchronous>, transform_indices = @transform_1, window_bounds = array<i64: 16, 128>}, {pipeline_mode = #tpu.pipeline_mode<synchronous>, transform_indices = @transform_2, window_bounds = array<i64: 1, 128>}, {transform_indices = @transform_3, window_bounds = array<i64: 64, 128>}]} {
    %c0 = arith.constant 0 : index
    %c0_0 = arith.constant 0 : index
    %0 = vector.load %arg1[%c0, %c0_0] : memref<64x16xf32, #tpu.memory_space<vmem>>, vector<64x16xf32>
    %c0_1 = arith.constant 0 : index
    %c0_2 = arith.constant 0 : index
    %1 = vector.load %arg2[%c0_1, %c0_2] : memref<16x128xf32, #tpu.memory_space<vmem>>, vector<16x128xf32>
    %cst = arith.constant dense<0.000000e+00> : vector<64x128xf32>
    %2 = tpu.matmul %0, %1, %cst {dimension_numbers = #tpu.dot_dimension_numbers<[1], [0], [0], [1], [0, 0, 1, 1], [], []>} : vector<64x16xf32>, vector<16x128xf32>, vector<64x128xf32> -> vector<64x128xf32>
    %c0_3 = arith.constant 0 : index
    %c0_4 = arith.constant 0 : index
    %3 = vector.load %arg3[%c0_3, %c0_4] : memref<1x128xf32, #tpu.memory_space<vmem>>, vector<1x128xf32>
    %4 = vector.broadcast %3 : vector<1x128xf32> to vector<64x128xf32>
    %5 = arith.addf %2, %4 : vector<64x128xf32>
    %6 = math.sin %5 : vector<64x128xf32>
    %c0_5 = arith.constant 0 : index
    %c0_6 = arith.constant 0 : index
    %7 = vector.load %arg4[%c0_5, %c0_6] : memref<64x128xf32, #tpu.memory_space<vmem>>, vector<64x128xf32>
    tpu.vector_store %arg4[%c0_5, %c0_6], %6 {strides = array<i32>} : memref<64x128xf32, #tpu.memory_space<vmem>>, vector<64x128xf32>,
    return
  }
  func.func @transform_0(%arg0: i32) -> (i32, i32) {
    %c0_i32 = arith.constant 0 : i32
    %c0_i32_0 = arith.constant 0 : i32
    return %arg0, %c0_i32 : i32, i32
  }
  func.func @transform_1(%arg0: i32) -> (i32, i32) {
    %c0_i32 = arith.constant 0 : i32
    %c0_i32_0 = arith.constant 0 : i32
    %c0_i32_1 = arith.constant 0 : i32
    return %c0_i32, %c0_i32_0 : i32, i32
  }
  func.func @transform_2(%arg0: i32) -> (i32, i32) {
    %c0_i32 = arith.constant 0 : i32
    %c0_i32_0 = arith.constant 0 : i32
    %c0_i32_1 = arith.constant 0 : i32
    return %c0_i32, %c0_i32_0 : i32, i32
  }
  func.func @transform_3(%arg0: i32) -> (i32, i32) {
    %c0_i32 = arith.constant 0 : i32
    %c0_i32_0 = arith.constant 0 : i32
    return %arg0, %c0_i32 : i32, i32
  }
}

</mosaic_0001>

<bundles_post_ra>
// kernel: tpu_custom_call.1
= control target key start
LH: loop header
LB: loop body
LE: loop exit
PB: predicated region body
PF: predicated region fallthrough
CT: control target
= control target key end

     0   :  { %8 = vsyncpa [#allocation3], 0  ;;  %s2305_s0 = inlined_call_operand.vmem [shape: f32[256,16], index: 0, kind: input, shape index: {}]   ;;  %s2306_s1 = inlined_call_operand.vmem [shape: f32[16,128], index: 1, kind: input, shape index: {}]   ;;  %s2307_s2 = inlined_call_operand.vmem [shape: f32[1,128], index: 2, kind: input, shape index: {}]   ;;  %s2308_s3 = inlined_call_operand.hbm [shape: f32[256,128], index: 3, kind: output, shape index: {}]  }
   0x1   :  { %10 = vsyncpa [#allocation3 + $0x1], 0  ;;  %s1526_s12 = smov 0   ;;  %s1528_s13 = smov 0  }
   0x2   :  { %s1530_s14 = smov 0   ;;  %s1532_s15 = smov 0  }
   0x3 LB: > { %s1547_s16 = sadd.s32 4294967295, %s1495_s15   ;;  %s1235_s17 = sadd.s32 4294967294, %s1495_s15   ;;  %s1495_s15 = sphi %s1532_s15, %s2326_s15   ;;  %s1491_s14 = sphi %s1530_s14, %s2325_s14   ;;  %s1487_s13 = sphi %s1528_s13, %s2324_s13   ;;  %s1483_s12 = sphi %s1526_s12, %s2323_s12  }
   0x4   : > { %s1551_s18 = sadd.s32 1, %s1495_s15   ;;  %s91_s19 = sadd.s32 1, %s1491_s14 }
   0x5   : > { %s88_s20 = ssub.s32 %s1495_s15, %s1551_s18  ;;  %p101_p0 = scmp.ne.s32.totalorder %s1491_s14, %s1487_s13 }
   0x6   : > { %p89_p1 = scmp.eq.s32.totalorder %s88_s20, 0  ;;  %p102_p2 = scmp.eq.s32.totalorder %s1547_s16, 3 }
   0x7   : > { %p107_p3 = scmp.ne.s32.totalorder %s1487_s13, %s1483_s12  ;;  %p108_p4 = scmp.eq.s32.totalorder %s1235_s17, 3 }
   0x8   : > { %s1562_s21 = scalar_select %p89_p1, %s1491_s14, %s91_s19  }
   0x9   : > { %p1564_p5 = por %p102_p2, %p101_p0  ;;  %p1568_p6 = por %p108_p4, %p107_p3 }
   0xa   : > { %p1238_p7 = scmp.ge.s32.totalorder %s1495_s15, 1  ;;  %p141_p8 = scmp.lt.s32.totalorder %s1495_s15, 5 }
   0xc   : > { %p142_p9 = pnand %p1238_p7, %p141_p8 }
   0xd   : > { %v180_v0 = vld [vmem:[%s2306_s1] sm:$0xff] (!%p142_p9)  ;;  %v181_v1 = vld [vmem:[%s2306_s1 + $0x8] sm:$0xff] (!%p142_p9)  ;;  %s1240_s28 = sshll.u32 (!%p142_p9), %s1547_s16, 3  ;;  %vm189_vm0 = vcmask (!%p142_p9), 130048   ;;  %v1497_v52 = vmov (!%p142_p9), 683565275  }
   0xe   : > { %145 = sbr.rel (%p142_p9) target bundleno = 490 (0x1ea), region = 32  ;;  %v1315_v2 = vpack.c.bf16 (!%p142_p9), %v181_v1, %v180_v0  ;;  %p166_p10 = scmp.lt.s32.totalorder (!%p142_p9), %s1240_s28, 31  ;;  %v1595_v11 = vld [vmem:[%s2307_s2] ss:$0 sm:$0xff] (!%p142_p9)  ;;  %v1498_v56 = vmov (!%p142_p9), 2475754826  }
   0xf   : > { %v1499_v58 = vmov (!%p142_p9), 2131351028   ;;  %v1500_v60 = vmov (!%p142_p9), 2102212464   ;;  %v1501_v62 = vmov (!%p142_p9), 920167782  }
  0x10   : > { %1316 = vmatprep.subr.bf16.mxu0 (!%p142_p9), %v1315_v2  ;;  %1319 = vmatprep.subr.bf16.mxu1 (!%p142_p9), %v1315_v2  ;;  %s162_s8 = sand.u32 (!%p142_p9), 1, %s1487_s13   ;;  %s1288_s19 = sshll.u32 (!%p142_p9), %s1547_s16, 10 }
  0x11   : > { %1318 = vmatpush3.bf16.msra.mxu0 (!%p142_p9), %v1315_v2  ;;  %1320 = vmatpush3.bf16.msra.mxu1 (!%p142_p9), %v1315_v2  ;;  %s1239_s9 = sshll.u32 (!%p142_p9), %s162_s8, 6  ;;  %s2256_s26 = scalar_lea.hbm (!%p142_p9), %s2308_s3, %s1288_s19 }
  0x12   : > { %s1909_s10 = scalar_lea.vmem (!%p142_p9), [#allocation2], %s1239_s9  ;;  %s2264_s16 = scalar_lea.sflag (!%p142_p9), [#allocation3], %s162_s8 }
  0x13   : > { %s1173_s20 = sshll.u32 (!%p142_p9), %s1909_s10, 4  ;;  %s2258_s20 = int_to_ptr.vmem [resolvable:$true] %s1173_s20 }
  0x14   : > { %s1433_s27 = scalar_lea.vmem (!%p142_p9), %s2258_s20, 1024 }
  0x15   : > { %s2328_s28 = smov (!%p166_p10, %s1240_s28), 31  ;;  %p1434_p11 = scmp.ne.s32.totalorder %s2258_s20, %s1433_s27 }
  0x16   : > { %s1241_s29 = sshll.u32 %s2328_s28, 3  ;;  %s1503_s28 = smov [#allocation2]  }
  0x17   : > { %s169_s5 = scalar_lea.vmem %s2305_s0, %s1241_s29  ;;  %p1435_p12 = pnand %p1434_p11, %p1564_p5 }
  0x18   : > { %v172_v3 = vld [vmem:[%s169_s5] sm:$0xff]  ;;  %v173_v5 = vld [vmem:[%s169_s5 + $0x8] sm:$0xff]  ;;  %v174_v7 = vld [vmem:[%s169_s5 + $0x10] sm:$0xff]  ;;  %s1437_s29 = sshll.u32 %s1503_s28, 4  ;;  %s1438_s29 = int_to_ptr.vmem [resolvable:$false] %s1437_s29 }
  0x19   : > { %v176_v4 = vld [vmem:[%s169_s5 + $0x20] sm:$0xff]  ;;  %1303 = vmatprep.mubr.msk.f32.mxu0 %vm189_vm0, %v172_v3  ;;  %v177_v6 = vld [vmem:[%s169_s5 + $0x28] sm:$0xff]  ;;  %v178_v8 = vld [vmem:[%s169_s5 + $0x30] sm:$0xff]  ;;  %p1436_p13 = pneg %p1435_p12  ;;  %s1439_s30 = scalar_lea.vmem %s1438_s29, 2048 }
  0x1a   : > { %1309 = vmatprep.mubr.msk.f32.mxu1 %vm189_vm0, %v176_v4  ;;  %1304 = vmatmul.mubr.msk.f32.vlgmr.msra.gmra.mrb[0].mxu0 %vm189_vm0, %v173_v5  ;;  %v175_v9 = vld [vmem:[%s169_s5 + $0x18] sm:$0xff]  ;;  %v1502_v5 = vmov 1326507024   ;;  %p1440_p0 = scmp.lt.s32.totalorder %s2258_s20, %s1438_s29  ;;  %p1441_p1 = scmp.lt.s32.totalorder %s1439_s30, %s1433_s27 }
  0x1b   : > { %1310 = vmatmul.mubr.msk.f32.vlgmr.msra.gmra.mrb[0].mxu1 %vm189_vm0, %v177_v6  ;;  %1306 = vmatprep.mubr.msk.f32.mxu0 %vm189_vm0, %v174_v7  ;;  %v179_v10 = vld [vmem:[%s169_s5 + $0x38] sm:$0xff] }
  0x1c   : > { %1312 = vmatprep.mubr.msk.f32.mxu1 %vm189_vm0, %v178_v8  ;;  %p1442_p2 = por %p1441_p1, %p1440_p0 }
  0x1e   : > { %1307 = vmatmul.mubr.msk.f32.gmra.mrb[2].mxu0 %vm189_vm0, %v175_v9  ;;  %p1443_p3 = pnand %p1442_p2, %p1436_p13 }
  0x1f   : > { %1313 = vmatmul.mubr.msk.f32.gmra.mrb[2].mxu1 %vm189_vm0, %v179_v10 }
  0xed   : > { %v1305_v12 = vpop.f32.mrb[0].mxu0 }
  0xee   : > { %v1311_v13 = vpop.f32.mrb[0].mxu1  ;;  %v1598_v14 = vadd.f32 %v1305_v12, %v1595_v11  ;;  %v280_v16 = vpop.f32.mrb[1].mxu0 }
  0xef   : > { %v1601_v15 = vadd.f32 %v1311_v13, %v1595_v11  ;;  %v300_v17 = vpop.f32.mrb[1].mxu1  ;;  %v1604_v18 = vadd.f32 %v1595_v11, %v280_v16 }
  0xf0   : > { %v423_v19 = vand.u32 2147483647, %v1598_v14  ;;  %v426_v20 = vand.u32 2139095040, %v1598_v14  ;;  %v1622_v36 = vadd.f32 %v1595_v11, %v300_v17  ;;  %vm425_vm14 = vcmp.lt.s32.totalorder %v1598_v14, 0 }
  0xf1   : > { %v839_v21 = vand.u32 2147483647, %v1601_v15  ;;  %v842_v22 = vand.u32 2139095040, %v1601_v15  ;;  %v1610_v23 = vpop.f32.mrb[2].mxu0  ;;  %v322_v29 = vand.u32 2139095040, %v1604_v18 }
  0xf2   : > { %v1612_v24 = vpop.f32.mrb[2].mxu1  ;;  %v427_v25 = vshrl.u32 %v426_v20, 23  ;;  %v430_v26 = vand.u32 8388607, %v423_v19  ;;  %v1619_v31 = vpop.f32.mrb[3].mxu0  ;;  %v738_v50 = vand.u32 2139095040, %v1622_v36 }
  0xf3   : > { %v843_v27 = vshrl.u32 %v842_v22, 23  ;;  %v846_v28 = vand.u32 8388607, %v839_v21  ;;  %v323_v33 = vshrl.u32 %v322_v29, 23  ;;  %v319_v39 = vand.u32 2147483647, %v1604_v18 }
  0xf4   : > { %v1255_v30 = vadd.s32 4294967169, %v427_v25  ;;  %v431_v34 = vor.u32 8388608, %v430_v26  ;;  %v1625_v41 = vpop.f32.mrb[3].mxu1  ;;  %vm1723_vm15 = vcmp.le.f32.partialorder %v423_v19, 0.7853982 }
  0xf5   : > { %v1271_v32 = vadd.s32 4294967169, %v843_v27  ;;  %v847_v37 = vor.u32 8388608, %v846_v28  ;;  %v1251_v40 = vadd.s32 4294967169, %v323_v33  ;;  %v1633_v48 = vand.u32 8388607, %v319_v39 }
  0xf6   : > { %v433_v35 = vadd.s32 1, %v1255_v30  ;;  %v1627_v45 = vshll.u32 %v431_v34, 8 }
  0xf7   : > { %v849_v38 = vadd.s32 1, %v1271_v32  ;;  %v1629_v47 = vshll.u32 %v847_v37, 8  ;;  %v1635_v49 = vadd.s32 1, %v1251_v40 }
  0xf8   : > { %vm434_vm1 = vcmp.gt.s32.totalorder %v433_v35, 0 }
  0xf9   : > { %v435_v42 = vsel %vm434_vm1, %v433_v35, 0  ;;  %vm850_vm2 = vcmp.gt.s32.totalorder %v849_v38, 0  ;;  %vm330_vm7 = vcmp.gt.s32.totalorder %v1635_v49, 0 }
  0xfa   : > { %v436_v43 = vshrl.u32 %v435_v42, 5  ;;  %v437_v44 = vand.u32 31, %v435_v42  ;;  %v851_v46 = vsel %vm850_vm2, %v849_v38, 0 }
  0xfb   : > { %v1639_v54 = vshrl.u32 %v851_v46, 5  ;;  %v853_v55 = vand.u32 31, %v851_v46 }
  0xfc   : > { %v438_v51 = vsub.s32 32, %v437_v44  ;;  %v440_v53 = vshll.u32 %v1497_v52, %v437_v44  ;;  %v443_v57 = vshll.u32 %v1498_v56, %v437_v44  ;;  %v446_v59 = vshll.u32 %v1499_v58, %v437_v44 }
  0xfd   : > { %v449_v61 = vshll.u32 %v1500_v60, %v437_v44  ;;  %v452_v63 = vshll.u32 %v1501_v62, %v437_v44  ;;  %vm455_vm3 = vcmp.lt.s32.totalorder %v436_v43, 1  ;;  %vm456_vm4 = vcmp.lt.s32.totalorder %v436_v43, 2 }
  0xfe   : > { %v441_v0 = vshrl.u32 %v1498_v56, %v438_v51  ;;  %v444_v1 = vshrl.u32 %v1499_v58, %v438_v51  ;;  %v447_v2 = vshrl.u32 %v1500_v60, %v438_v51  ;;  %v439_v3 = vshrl.u32 %v1497_v52, %v438_v51 }
  0xff   : > { %v450_v4 = vshrl.u32 %v1501_v62, %v438_v51  ;;  %v453_v6 = vshrl.u32 %v1502_v5, %v438_v51  ;;  %v854_v10 = vsub.s32 32, %v853_v55  ;;  %vm457_vm5 = vcmp.lt.s32.totalorder %v436_v43, 3 }
 0x100   : > { %v442_v7 = vor.u32 %v441_v0, %v440_v53  ;;  %v445_v8 = vor.u32 %v444_v1, %v443_v57  ;;  %v448_v9 = vor.u32 %v447_v2, %v446_v59  ;;  %vm458_vm6 = vcmp.lt.s32.totalorder %v436_v43, 4 }
 0x101   : > { %v451_v12 = vor.u32 %v450_v4, %v449_v61  ;;  %v454_v13 = vor.u32 %v453_v6, %v452_v63  ;;  %v856_v28 = vshll.u32 %v1497_v52, %v853_v55  ;;  %v857_v32 = vshrl.u32 %v1498_v56, %v854_v10 }
 0x102   : > { %v459_v16 = vsel %vm455_vm3, %v439_v3, %v442_v7  ;;  %v460_v17 = vsel %vm458_vm6, %v448_v9, 2102212464  ;;  %v463_v20 = vsel %vm455_vm3, %v442_v7, %v445_v8  ;;  %v467_v22 = vsel %vm455_vm3, %v445_v8, %v448_v9 }
 0x103   : > { %v461_v25 = vsel %vm457_vm5, %v445_v8, %v460_v17  ;;  %v464_v26 = vsel %vm458_vm6, %v451_v12, 920167782  ;;  %v468_v27 = vsel %vm458_vm6, %v454_v13, 1326507024  ;;  %v859_v33 = vshll.u32 %v1498_v56, %v853_v55 }
 0x104   : > { %v465_v29 = vsel %vm457_vm5, %v448_v9, %v464_v26  ;;  %v469_v30 = vsel %vm457_vm5, %v451_v12, %v468_v27  ;;  %v462_v34 = vsel %vm456_vm4, %v459_v16, %v461_v25  ;;  %v860_v38 = vshrl.u32 %v1499_v58, %v854_v10 }
 0x105   : > { %v466_v35 = vsel %vm456_vm4, %v463_v20, %v465_v29  ;;  %v470_v37 = vsel %vm456_vm4, %v467_v22, %v469_v30  ;;  %v858_v51 = vor.u32 %v857_v32, %v856_v28  ;;  %v862_v57 = vshll.u32 %v1499_v58, %v853_v55 }
 0x106   : > { %v1663_v40 = vmul.u32.u64.low %v1627_v45, %v470_v37  ;;  %v1664_v42 = vmul.u32.u64.high %v1627_v45, %v470_v37, %v1663_v40  ;;  %v1667_v44 = vmul.u32.u64.low %v1627_v45, %v466_v35  ;;  %v1668_v46 = vmul.u32.u64.high %v1627_v45, %v466_v35, %v1667_v44 }
 0x107   : > { %v861_v53 = vor.u32 %v860_v38, %v859_v33  ;;  %v863_v59 = vshrl.u32 %v1500_v60, %v854_v10  ;;  %v855_v61 = vshrl.u32 %v1497_v52, %v854_v10  ;;  %v865_v43 = vshll.u32 %v1500_v60, %v853_v55 }
 0x108   : > { %v866_v63 = vshrl.u32 %v1501_v62, %v854_v10  ;;  %v869_v0 = vshrl.u32 %v1502_v5, %v854_v10  ;;  %v478_v1 = vmul.u32 %v1627_v45, %v462_v34  ;;  %v868_v3 = vshll.u32 %v1501_v62, %v853_v55 }
 0x109   : > { %v864_v2 = vor.u32 %v863_v59, %v862_v57  ;;  %vm871_vm8 = vcmp.lt.s32.totalorder %v1639_v54, 1  ;;  %vm480_vm9 = vc.u32 %v1664_v42, %v1667_v44  ;;  %v481_v4 = vadd.s32 1, %v1668_v46 }
 0x10a   : > { %v867_v6 = vor.u32 %v866_v63, %v865_v43  ;;  %vm872_vm10 = vcmp.lt.s32.totalorder %v1639_v54, 2  ;;  %v870_v7 = vor.u32 %v869_v0, %v868_v3  ;;  %vm873_vm11 = vcmp.lt.s32.totalorder %v1639_v54, 3 }
 0x10b   : > { %vm874_vm12 = vcmp.lt.s32.totalorder %v1639_v54, 4  ;;  %v879_v8 = vsel %vm871_vm8, %v858_v51, %v861_v53  ;;  %v482_v45 = vsel %vm480_vm9, %v481_v4, %v1668_v46  ;;  %v883_v55 = vsel %vm871_vm8, %v861_v53, %v864_v2 }
 0x10c   : > { %v876_v9 = vsel %vm874_vm12, %v864_v2, 2102212464  ;;  %v880_v10 = vsel %vm874_vm12, %v867_v6, 920167782  ;;  %v483_v12 = vadd.s32 %v482_v45, %v478_v1  ;;  %v875_v13 = vsel %vm871_vm8, %v855_v61, %v858_v51 }
 0x10d   : > { %v881_v16 = vsel %vm873_vm11, %v864_v2, %v880_v10  ;;  %v884_v17 = vsel %vm874_vm12, %v870_v7, 1326507024  ;;  %v877_v20 = vsel %vm873_vm11, %v861_v53, %v876_v9  ;;  %v331_v26 = vsel %vm330_vm7, %v1635_v49, 0 }
 0x10e   : > { %v882_v22 = vsel %vm872_vm10, %v879_v8, %v881_v16  ;;  %v885_v25 = vsel %vm873_vm11, %v867_v6, %v884_v17  ;;  %v484_v27 = vadd.s32 536870912, %v483_v12  ;;  %v735_v34 = vand.u32 2147483647, %v1622_v36 }
 0x10f   : > { %v886_v28 = vsel %vm872_vm10, %v883_v55, %v885_v25  ;;  %v1693_v29 = vmul.u32.u64.low %v1629_v47, %v882_v22  ;;  %v1694_v30 = vmul.u32.u64.high %v1629_v47, %v882_v22, %v1693_v29  ;;  %v878_v37 = vsel %vm872_vm10, %v875_v13, %v877_v20 }
 0x110   : > { %v1698_v32 = vmul.u32.u64.low %v1629_v47, %v886_v28  ;;  %v1699_v33 = vmul.u32.u64.high %v1629_v47, %v886_v28, %v1698_v32  ;;  %v485_v35 = vshrl.u32 %v484_v27, 30  ;;  %v327_v49 = vor.u32 8388608, %v1633_v48 }
 0x111   : > { %v333_v38 = vand.u32 31, %v331_v26  ;;  %v897_v46 = vadd.s32 1, %v1694_v30  ;;  %v739_v53 = vshrl.u32 %v738_v50, 23  ;;  %v894_v57 = vmul.u32 %v1629_v47, %v878_v37 }
 0x112   : > { %v486_v40 = vshll.u32 %v485_v35, 30  ;;  %vm896_vm13 = vc.u32 %v1699_v33, %v1693_v29  ;;  %v1713_v59 = vand.u32 8388607, %v735_v34  ;;  %v1719_v61 = vshll.u32 %v327_v49, 8 }
 0x113   : > { %v334_v51 = vsub.s32 32, %v333_v38  ;;  %v898_v54 = vsel %vm896_vm13, %v897_v46, %v1694_v30  ;;  %v479_v47 = vadd.s32 %v1667_v44, %v1664_v42  ;;  %v1728_v63 = vshrl.u32 %v331_v26, 5 }
 0x114   : > { %v1716_v48 = vsub.s32 %v483_v12, %v486_v40  ;;  %v899_v43 = vadd.s32 %v898_v54, %v894_v57  ;;  %v1267_v4 = vadd.s32 4294967169, %v739_v53  ;;  %v509_v6 = vsub.s32 4, %v485_v35 }
 0x115   : > { %v337_v0 = vshrl.u32 %v1498_v56, %v334_v51  ;;  %v340_v2 = vshrl.u32 %v1499_v58, %v334_v51  ;;  %v343_v3 = vshrl.u32 %v1500_v60, %v334_v51  ;;  %v336_v19 = vshll.u32 %v1497_v52, %v333_v38 }
 0x116   : > { %v489_v1 = vsub.s32 0, %v1716_v48  ;;  %v900_v7 = vadd.s32 536870912, %v899_v43  ;;  %v743_v8 = vor.u32 8388608, %v1713_v59  ;;  %v339_v44 = vshll.u32 %v1498_v56, %v333_v38 }
 0x117   : > { %v342_v45 = vshll.u32 %v1499_v58, %v333_v38  ;;  %v346_v9 = vshrl.u32 %v1501_v62, %v334_v51  ;;  %v338_v55 = vor.u32 %v337_v0, %v336_v19  ;;  %v345_v12 = vshll.u32 %v1500_v60, %v333_v38 }
 0x118   : > { %v1256_v42 = vmin.u32 %v489_v1, %v1716_v48  ;;  %v901_v10 = vshrl.u32 %v900_v7, 30  ;;  %v349_v13 = vshrl.u32 %v1502_v5, %v334_v51  ;;  %v341_v17 = vor.u32 %v340_v2, %v339_v44 }
 0x119   : > { %v344_v20 = vor.u32 %v343_v3, %v342_v45  ;;  %v348_v22 = vshll.u32 %v1501_v62, %v333_v38  ;;  %v510_v25 = vsel %vm425_vm14, %v509_v6, %v485_v35  ;;  %v347_v27 = vor.u32 %v346_v9, %v345_v12 }
 0x11a   : > { %v491_v16 = vclz %v1256_v42  ;;  %v902_v26 = vshll.u32 %v901_v10, 30  ;;  %vm351_vm0 = vcmp.lt.s32.totalorder %v1728_v63, 1  ;;  %vm352_vm1 = vcmp.lt.s32.totalorder %v1728_v63, 2 }
 0x11b   : > { %v350_v30 = vor.u32 %v349_v13, %v348_v22  ;;  %vm354_vm2 = vcmp.lt.s32.totalorder %v1728_v63, 4  ;;  %vm841_vm3 = vcmp.lt.s32.totalorder %v1601_v15, 0  ;;  %v335_v37 = vshrl.u32 %v1497_v52, %v334_v51 }
 0x11c   : > { %v1257_v28 = vadd.s32 4294967294, %v491_v16  ;;  %v1749_v32 = vsub.s32 %v899_v43, %v902_v26  ;;  %vm353_vm4 = vcmp.lt.s32.totalorder %v1728_v63, 3  ;;  %v360_v35 = vsel %vm354_vm2, %v347_v27, 920167782 }
 0x11d   : > { %v512_v49 = vsel %vm1723_vm15, 0, %v510_v25  ;;  %v359_v38 = vsel %vm351_vm0, %v338_v55, %v341_v17  ;;  %v361_v40 = vsel %vm353_vm4, %v344_v20, %v360_v35  ;;  %v925_v57 = vsub.s32 4, %v901_v10 }
 0x11e   : > { %vm1258_vm5 = vcmp.lt.s32.totalorder %v1257_v28, 0  ;;  %v905_v53 = vsub.s32 0, %v1749_v32  ;;  %v363_v51 = vsel %vm351_vm0, %v341_v17, %v344_v20  ;;  %vm1766_vm6 = vcmp.le.f32.partialorder %v839_v21, 0.7853982 }
 0x11f   : > { %v494_v46 = vsel %vm1258_vm5, 0, %v1257_v28  ;;  %v356_v1 = vsel %vm354_vm2, %v344_v20, 2102212464  ;;  %v364_v2 = vsel %vm354_vm2, %v350_v30, 1326507024  ;;  %v362_v7 = vsel %vm352_vm1, %v359_v38, %v361_v40 }
 0x120   : > { %v495_v54 = vsub.s32 32, %v494_v46  ;;  %v499_v43 = vsub.s32 4294967266, %v494_v46  ;;  %v496_v3 = vshll.u32 %v1716_v48, %v494_v46  ;;  %v1272_v6 = vmin.u32 %v905_v53, %v1749_v32 }
 0x121   : > { %v365_v19 = vsel %vm353_vm4, %v347_v27, %v364_v2  ;;  %v745_v45 = vadd.s32 1, %v1267_v4  ;;  %v516_v9 = vadd.s32 3, %v512_v49  ;;  %v355_v13 = vsel %vm351_vm0, %v335_v37, %v338_v55 }
 0x122   : > { %v497_v21 = vshrl.u32 %v479_v47, %v495_v54  ;;  %v500_v42 = vadd.s32 127, %v499_v43  ;;  %v366_v44 = vsel %vm352_vm1, %v363_v51, %v365_v19  ;;  %v907_v12 = vclz %v1272_v6 }
 0x123   : > { %v357_v48 = vsel %vm353_vm4, %v341_v17, %v356_v1  ;;  %v1787_v22 = vmul.u32.u64.low %v1719_v61, %v366_v44  ;;  %v1788_v25 = vmul.u32.u64.high %v1719_v61, %v366_v44, %v1787_v22  ;;  %vm746_vm7 = vcmp.gt.s32.totalorder %v745_v45, 0 }
 0x124   : > { %v498_v16 = vor.u32 %v497_v21, %v496_v3  ;;  %v501_v20 = vshll.u32 %v500_v42, 23  ;;  %v1273_v47 = vadd.s32 4294967294, %v907_v12  ;;  %v895_v55 = vadd.s32 %v1693_v29, %v1699_v33 }
 0x125   : > { %v1791_v26 = vmul.u32.u64.low %v1719_v61, %v362_v7  ;;  %v1792_v27 = vmul.u32.u64.high %v1719_v61, %v362_v7, %v1791_v26  ;;  %v926_v17 = vsel %vm841_vm3, %v925_v57, %v901_v10  ;;  %v747_v28 = vsel %vm746_vm7, %v745_v45, 0 }
 0x126   : > { %v502_v4 = vor.u32 4788187, %v501_v20  ;;  %v1799_v30 = vand.u32 3, %v516_v9  ;;  %vm1274_vm8 = vcmp.lt.s32.totalorder %v1273_v47, 0  ;;  %v358_v37 = vsel %vm352_vm1, %v355_v13, %v357_v48 }
 0x127   : > { %v749_v35 = vand.u32 31, %v747_v28  ;;  %v505_v38 = vcvt.s32.f32 %v498_v16  ;;  %v910_v40 = vsel %vm1274_vm8, 0, %v1273_v47  ;;  %vm376_vm9 = vc.u32 %v1788_v25, %v1791_v26 }
 0x128   : > { %v503_v49 = vand.u32 2147483647, %v502_v4  ;;  %v911_v46 = vsub.s32 32, %v910_v40  ;;  %v915_v53 = vsub.s32 4294967266, %v910_v40  ;;  %v928_v29 = vsel %vm1766_vm6, 0, %v926_v17 }
 0x129   : > { %v377_v33 = vadd.s32 1, %v1792_v27  ;;  %v374_v57 = vmul.u32 %v1719_v61, %v358_v37  ;;  %v1809_v51 = vshrl.u32 %v747_v28, 5  ;;  %v750_v63 = vsub.s32 32, %v749_v35 }
 0x12a   : > { %v506_v10 = vmul.f32 %v505_v38, %v503_v49  ;;  %v912_v54 = vshll.u32 %v1749_v32, %v910_v40  ;;  %v913_v43 = vshrl.u32 %v895_v55, %v911_v46  ;;  %v916_v1 = vadd.s32 127, %v915_v53 }
 0x12b   : > { %v378_v2 = vsel %vm376_vm9, %v377_v33, %v1792_v27  ;;  %v752_v7 = vshll.u32 %v1497_v52, %v749_v35  ;;  %v753_v19 = vshrl.u32 %v1498_v56, %v750_v63  ;;  %v755_v44 = vshll.u32 %v1498_v56, %v749_v35 }
 0x12c   : > { %v507_v3 = vxor.u32 2147483648, %v506_v10  ;;  %v379_v6 = vadd.s32 %v378_v2, %v374_v57  ;;  %v914_v21 = vor.u32 %v913_v43, %v912_v54  ;;  %v917_v42 = vshll.u32 %v916_v1, 23 }
 0x12d   : > { %v756_v61 = vshrl.u32 %v1499_v58, %v750_v63  ;;  %v758_v9 = vshll.u32 %v1499_v58, %v749_v35  ;;  %v759_v12 = vshrl.u32 %v1500_v60, %v750_v63  ;;  %v754_v16 = vor.u32 %v753_v19, %v752_v7 }
 0x12e   : > { %v508_v45 = vsel %vm425_vm14, %v507_v3, %v506_v10  ;;  %v380_v32 = vadd.s32 536870912, %v379_v6  ;;  %v918_v48 = vor.u32 4788187, %v917_v42  ;;  %v761_v20 = vshll.u32 %v1500_v60, %v749_v35 }
 0x12f   : > { %v511_v13 = vsel %vm1723_vm15, %v1598_v14, %v508_v45  ;;  %v921_v22 = vcvt.s32.f32 %v914_v21  ;;  %v762_v27 = vshrl.u32 %v1501_v62, %v750_v63  ;;  %v757_v55 = vor.u32 %v756_v61, %v755_v44 }
 0x130   : > { %1400 = vcosq.f32 %v511_v13  ;;  %v1825_v47 = vshrl.u32 %v380_v32, 30  ;;  %v919_v4 = vand.u32 2147483647, %v918_v48  ;;  %v765_v17 = vshrl.u32 %v1502_v5, %v750_v63 }
 0x131   : > { %1402 = vsinq.f32 %v511_v13  ;;  %v763_v37 = vor.u32 %v762_v27, %v761_v20  ;;  %v760_v49 = vor.u32 %v759_v12, %v758_v9  ;;  %v764_v38 = vshll.u32 %v1501_v62, %v749_v35 }
 0x132   : > { %v382_v28 = vshll.u32 %v1825_v47, 30  ;;  %v922_v50 = vmul.f32 %v921_v22, %v919_v4  ;;  %v932_v40 = vadd.s32 3, %v928_v29  ;;  %vm767_vm10 = vcmp.lt.s32.totalorder %v1809_v51, 1 }
 0x133   : > { %v1836_v53 = vshll.u32 %v743_v8, 8  ;;  %vm519_vm11 = vcmp.eq.s32.totalorder %v1799_v30, 0  ;;  %v766_v10 = vor.u32 %v765_v17, %v764_v38  ;;  %vm770_vm12 = vcmp.lt.s32.totalorder %v1809_v51, 4 }
 0x134   : > { %v1831_v46 = vsub.s32 %v379_v6, %v382_v28  ;;  %v923_v33 = vxor.u32 2147483648, %v922_v50  ;;  %v775_v57 = vsel %vm767_vm10, %v754_v16, %v757_v55  ;;  %vm518_vm13 = vcmp.lt.s32.totalorder %v1799_v30, 2 }
 0x135   : > { %v751_v29 = vshrl.u32 %v1497_v52, %v750_v63  ;;  %vm769_vm14 = vcmp.lt.s32.totalorder %v1809_v51, 3  ;;  %v776_v59 = vsel %vm770_vm12, %v763_v37, 920167782  ;;  %vm515_vm15 = vweird.f32 %v1598_v14 }
 0x136   : > { %v385_v35 = vsub.s32 0, %v1831_v46  ;;  %v924_v8 = vsel %vm841_vm3, %v923_v33, %v922_v50  ;;  %vm321_vm0 = vcmp.lt.s32.totalorder %v1604_v18, 0  ;;  %vm768_vm1 = vcmp.lt.s32.totalorder %v1809_v51, 2 }
 0x137   : > { %v772_v54 = vsel %vm770_vm12, %v760_v49, 2102212464  ;;  %v777_v63 = vsel %vm769_vm14, %v760_v49, %v776_v59  ;;  %v927_v43 = vsel %vm1766_vm6, %v1601_v15, %v924_v8  ;;  %v779_v3 = vsel %vm767_vm10, %v757_v55, %v760_v49 }
 0x138   : > { %v1252_v1 = vmin.u32 %v385_v35, %v1831_v46  ;;  %v778_v2 = vsel %vm768_vm1, %v775_v57, %v777_v63  ;;  %1404 = vcosq.f32 %v927_v43  ;;  %v780_v6 = vsel %vm770_vm12, %v766_v10, 1326507024 }
 0x139   : > { %v1869_v7 = vmul.u32.u64.low %v1836_v53, %v778_v2  ;;  %v1870_v19 = vmul.u32.u64.high %v1836_v53, %v778_v2, %v1869_v7  ;;  %vm522_vm2 = vcmp.eq.s32.totalorder %v1799_v30, 2  ;;  %1406 = vsinq.f32 %v927_v43 }
 0x13a   : > { %v1401_v21 = vpop.eup %1400  ;;  %v387_v0 = vclz %v1252_v1  ;;  %v405_v42 = vsub.s32 4, %v1825_v47  ;;  %v771_v45 = vsel %vm767_vm10, %v751_v29, %v754_v16  ;;  %v773_v32 = vsel %vm769_vm14, %v757_v55, %v772_v54 }
 0x13b   : > { %v1403_v44 = vpop.eup %1402  ;;  %v523_v61 = vxor.u32 2147483648, %v1401_v21  ;;  %v781_v9 = vsel %vm769_vm14, %v763_v37, %v780_v6  ;;  %v1887_v20 = vadd.f32 %v1610_v23, %v1595_v11  ;;  %v933_v27 = vand.u32 3, %v932_v40 }
 0x13c   : > { %v520_v12 = vxor.u32 2147483648, %v1403_v44  ;;  %v1253_v13 = vadd.s32 4294967294, %v387_v0  ;;  %v782_v48 = vsel %vm768_vm1, %v779_v3, %v781_v9  ;;  %v774_v17 = vsel %vm768_vm1, %v771_v45, %v773_v32 }
 0x13d   : > { %v524_v22 = vsel %vm522_vm2, %v523_v61, %v1403_v44  ;;  %v1890_v4 = vmul.u32.u64.low %v1836_v53, %v782_v48  ;;  %v1891_v16 = vmul.u32.u64.high %v1836_v53, %v782_v48, %v1890_v4  ;;  %v793_v28 = vadd.s32 1, %v1870_v19 }
 0x13e   : > { %v521_v55 = vsel %vm519_vm11, %v1401_v21, %v520_v12  ;;  %vm1254_vm3 = vcmp.lt.s32.totalorder %v1253_v13, 0  ;;  %v375_v23 = vadd.s32 %v1791_v26, %v1788_v25  ;;  %v634_v49 = vand.u32 2139095040, %v1887_v20 }
 0x13f   : > { %v525_v37 = vsel %vm518_vm13, %v521_v55, %v524_v22  ;;  %v390_v50 = vsel %vm1254_vm3, 0, %v1253_v13  ;;  %vm931_vm4 = vweird.f32 %v1601_v15  ;;  %v406_v51 = vsel %vm321_vm0, %v405_v42, %v1825_v47 }
 0x140   : > { %v526_v38 = vsel %vm515_vm15, nan, %v525_v37  ;;  %v391_v40 = vsub.s32 32, %v390_v50  ;;  %v395_v33 = vsub.s32 4294967266, %v390_v50  ;;  %v790_v25 = vmul.u32 %v1836_v53, %v774_v17 }
 0x141   : > { %1152 = vst [vmem:[%s1909_s10 + $0x8] sm:$0xff] %v526_v38  ;;  %vm792_vm5 = vc.u32 %v1891_v16, %v1869_v7  ;;  %v631_v14 = vand.u32 2147483647, %v1887_v20  ;;  %v635_v26 = vshrl.u32 %v634_v49, 23  ;;  %v392_v30 = vshll.u32 %v1831_v46, %v390_v50 }
 0x142   : > { %v393_v10 = vshrl.u32 %v375_v23, %v391_v40  ;;  %v396_v57 = vadd.s32 127, %v395_v33  ;;  %v794_v35 = vsel %vm792_vm5, %v793_v28, %v1870_v19  ;;  %v1405_v29 = vpop.eup %1404  ;;  %vm938_vm6 = vcmp.eq.s32.totalorder %v933_v27, 2 }
 0x143   : > { %vm1920_vm7 = vcmp.le.f32.partialorder %v319_v39, 0.7853982  ;;  %v795_v53 = vadd.s32 %v794_v35, %v790_v25  ;;  %v1263_v59 = vadd.s32 4294967169, %v635_v26  ;;  %v1407_v8 = vpop.eup %1406  ;;  %v939_v54 = vxor.u32 2147483648, %v1405_v29 }
 0x144   : > { %v394_v63 = vor.u32 %v393_v10, %v392_v30  ;;  %v397_v43 = vshll.u32 %v396_v57, 23  ;;  %v408_v46 = vsel %vm1920_vm7, 0, %v406_v51  ;;  %v936_v1 = vxor.u32 2147483648, %v1407_v8 }
 0x145   : > { %v796_v2 = vadd.s32 536870912, %v795_v53  ;;  %v638_v3 = vand.u32 8388607, %v631_v14  ;;  %v641_v6 = vadd.s32 1, %v1263_v59  ;;  %vm934_vm8 = vcmp.lt.s32.totalorder %v933_v27, 2 }
 0x146   : > { %vm935_vm9 = vcmp.eq.s32.totalorder %v933_v27, 0  ;;  %v940_v39 = vsel %vm938_vm6, %v939_v54, %v1407_v8  ;;  %v398_v19 = vor.u32 4788187, %v397_v43  ;;  %v412_v0 = vadd.s32 3, %v408_v46 }
 0x147   : > { %v937_v21 = vsel %vm935_vm9, %v1405_v29, %v936_v1  ;;  %v1928_v42 = vshrl.u32 %v796_v2, 30  ;;  %vm642_vm10 = vcmp.gt.s32.totalorder %v641_v6, 0  ;;  %v401_v45 = vcvt.s32.f32 %v394_v63 }
 0x148   : > { %v941_v44 = vsel %vm934_vm8, %v937_v21, %v940_v39  ;;  %v399_v61 = vand.u32 2147483647, %v398_v19  ;;  %v643_v32 = vsel %vm642_vm10, %v641_v6, 0  ;;  %v639_v13 = vor.u32 8388608, %v638_v3 }
 0x149   : > { %v942_v9 = vsel %vm931_vm4, nan, %v941_v44  ;;  %v798_v12 = vshll.u32 %v1928_v42, 30  ;;  %v645_v22 = vand.u32 31, %v643_v32  ;;  %v1936_v55 = vand.u32 3, %v412_v0 }
 0x14a   : > { %1156 = vst [vmem:[%s1909_s10 + $0x28] sm:$0xff] %v942_v9  ;;  %v402_v48 = vmul.f32 %v401_v45, %v399_v61  ;;  %v1940_v28 = vadd.f32 %v1612_v24, %v1595_v11  ;;  %v791_v15 = vadd.s32 %v1869_v7, %v1891_v16  ;;  %v1945_v23 = vshrl.u32 %v643_v32, 5 }
 0x14b   : > { %v1934_v27 = vsub.s32 %v795_v53, %v798_v12  ;;  %v646_v17 = vsub.s32 32, %v645_v22  ;;  %v1947_v50 = vshll.u32 %v639_v13, 8  ;;  %v648_v38 = vshll.u32 %v1497_v52, %v645_v22 }
 0x14c   : > { %v403_v4 = vxor.u32 2147483648, %v402_v48  ;;  %v651_v16 = vshll.u32 %v1498_v56, %v645_v22  ;;  %v821_v25 = vsub.s32 4, %v1928_v42  ;;  %v654_v26 = vshll.u32 %v1499_v58, %v645_v22 }
 0x14d   : > { %v801_v37 = vsub.s32 0, %v1934_v27  ;;  %v649_v40 = vshrl.u32 %v1498_v56, %v646_v17  ;;  %v652_v33 = vshrl.u32 %v1499_v58, %v646_v17  ;;  %v655_v51 = vshrl.u32 %v1500_v60, %v646_v17 }
 0x14e   : > { %v404_v49 = vsel %vm321_vm0, %v403_v4, %v402_v48  ;;  %v1050_v30 = vand.u32 2139095040, %v1940_v28  ;;  %v657_v47 = vshll.u32 %v1500_v60, %v645_v22  ;;  %v658_v53 = vshrl.u32 %v1501_v62, %v646_v17 }
 0x14f   : > { %v407_v24 = vsel %vm1920_vm7, %v1604_v18, %v404_v49  ;;  %v1268_v7 = vmin.u32 %v801_v37, %v1934_v27  ;;  %v650_v57 = vor.u32 %v649_v40, %v648_v38  ;;  %v653_v35 = vor.u32 %v652_v33, %v651_v16 }
 0x150   : > { %1408 = vcosq.f32 %v407_v24  ;;  %v656_v29 = vor.u32 %v655_v51, %v654_v26  ;;  %vm663_vm11 = vcmp.lt.s32.totalorder %v1945_v23, 1  ;;  %v660_v8 = vshll.u32 %v1501_v62, %v645_v22 }
 0x151   : > { %1410 = vsinq.f32 %v407_v24  ;;  %v803_v10 = vclz %v1268_v7  ;;  %v661_v54 = vshrl.u32 %v1502_v5, %v646_v17  ;;  %vm664_vm12 = vcmp.lt.s32.totalorder %v1945_v23, 2 }
 0x152   : > { %vm418_vm13 = vcmp.eq.s32.totalorder %v1936_v55, 2  ;;  %v647_v63 = vshrl.u32 %v1497_v52, %v646_v17  ;;  %v659_v43 = vor.u32 %v658_v53, %v657_v47  ;;  %vm665_vm14 = vcmp.lt.s32.totalorder %v1945_v23, 3 }
 0x153   : > { %v1269_v59 = vadd.s32 4294967294, %v803_v10  ;;  %vm666_vm15 = vcmp.lt.s32.totalorder %v1945_v23, 4  ;;  %vm415_vm0 = vcmp.eq.s32.totalorder %v1936_v55, 0  ;;  %vm737_vm1 = vcmp.lt.s32.totalorder %v1622_v36, 0 }
 0x154   : > { %v662_v46 = vor.u32 %v661_v54, %v660_v8  ;;  %v668_v1 = vsel %vm666_vm15, %v656_v29, 2102212464  ;;  %v671_v2 = vsel %vm663_vm11, %v650_v57, %v653_v35  ;;  %vm414_vm3 = vcmp.lt.s32.totalorder %v1936_v55, 2 }
 0x155   : > { %vm1270_vm2 = vcmp.lt.s32.totalorder %v1269_v59, 0  ;;  %v667_v6 = vsel %vm663_vm11, %v647_v63, %v650_v57  ;;  %v672_v39 = vsel %vm666_vm15, %v659_v43, 920167782  ;;  %v1051_v19 = vshrl.u32 %v1050_v30, 23 }
 0x156   : > { %v806_v3 = vsel %vm1270_vm2, 0, %v1269_v59  ;;  %vm411_vm4 = vweird.f32 %v1604_v18  ;;  %v673_v44 = vsel %vm665_vm14, %v656_v29, %v672_v39  ;;  %v675_v61 = vsel %vm663_vm11, %v653_v35, %v656_v29 }
 0x157   : > { %v807_v21 = vsub.s32 32, %v806_v3  ;;  %v811_v0 = vsub.s32 4294967266, %v806_v3  ;;  %vm1991_vm5 = vcmp.le.f32.partialorder %v735_v34, 0.7853982  ;;  %v669_v32 = vsel %vm665_vm14, %v653_v35, %v668_v1 }
 0x158   : > { %v674_v9 = vsel %vm664_vm12, %v671_v2, %v673_v44  ;;  %v676_v12 = vsel %vm666_vm15, %v662_v46, 1326507024  ;;  %v1279_v13 = vadd.s32 4294967169, %v1051_v19  ;;  %v808_v48 = vshll.u32 %v1934_v27, %v806_v3 }
 0x159   : > { %v809_v22 = vshrl.u32 %v791_v15, %v807_v21  ;;  %v812_v4 = vadd.s32 127, %v811_v0  ;;  %v677_v34 = vsel %vm665_vm14, %v659_v43, %v676_v12  ;;  %v1047_v27 = vand.u32 2147483647, %v1940_v28 }
 0x15a   : > { %v1409_v17 = vpop.eup %1408  ;;  %v678_v37 = vsel %vm664_vm12, %v675_v61, %v677_v34  ;;  %v2007_v49 = vmul.u32.u64.low %v1947_v50, %v674_v9  ;;  %v2008_v38 = vmul.u32.u64.high %v1947_v50, %v674_v9, %v2007_v49  ;;  %v1057_v40 = vadd.s32 1, %v1279_v13 }
 0x15b   : > { %v1411_v33 = vpop.eup %1410  ;;  %v419_v24 = vxor.u32 2147483648, %v1409_v17  ;;  %v810_v7 = vor.u32 %v809_v22, %v808_v48  ;;  %v813_v16 = vshll.u32 %v812_v4, 23  ;;  %v670_v57 = vsel %vm664_vm12, %v667_v6, %v669_v32 }
 0x15c   : > { %v416_v15 = vxor.u32 2147483648, %v1411_v33  ;;  %v2013_v51 = vmul.u32.u64.low %v1947_v50, %v678_v37  ;;  %v2014_v26 = vmul.u32.u64.high %v1947_v50, %v678_v37, %v2013_v51  ;;  %vm1058_vm6 = vcmp.gt.s32.totalorder %v1057_v40, 0 }
 0x15d   : > { %v420_v30 = vsel %vm418_vm13, %v419_v24, %v1411_v33  ;;  %v814_v10 = vor.u32 4788187, %v813_v16  ;;  %v1059_v35 = vsel %vm1058_vm6, %v1057_v40, 0  ;;  %v822_v47 = vsel %vm737_vm1, %v821_v25, %v1928_v42 }
 0x15e   : > { %v417_v29 = vsel %vm415_vm0, %v1409_v17, %v416_v15  ;;  %v689_v53 = vadd.s32 1, %v2008_v38  ;;  %v1061_v59 = vand.u32 31, %v1059_v35  ;;  %v817_v63 = vcvt.s32.f32 %v810_v7 }
 0x15f   : > { %v421_v8 = vsel %vm414_vm3, %v417_v29, %v420_v30  ;;  %v815_v54 = vand.u32 2147483647, %v814_v10  ;;  %v1054_v23 = vand.u32 8388607, %v1047_v27  ;;  %v686_v46 = vmul.u32 %v1947_v50, %v670_v57 }
 0x160   : > { %v422_v43 = vsel %vm411_vm4, nan, %v421_v8  ;;  %vm688_vm7 = vc.u32 %v2014_v26, %v2007_v49  ;;  %v1062_v42 = vsub.s32 32, %v1061_v59  ;;  %v824_v55 = vsel %vm1991_vm5, 0, %v822_v47 }
 0x161   : > { %1151 = vst [vmem:[%s1909_s10] sm:$0xff] %v422_v43  ;;  %v818_v25 = vmul.f32 %v817_v63, %v815_v54  ;;  %v690_v1 = vsel %vm688_vm7, %v689_v53, %v2008_v38  ;;  %v1060_v2 = vshrl.u32 %v1059_v35, 5  ;;  %v1064_v6 = vshll.u32 %v1497_v52, %v1061_v59 }
 0x162   : > { %v691_v3 = vadd.s32 %v690_v1, %v686_v46  ;;  %v1065_v18 = vshrl.u32 %v1498_v56, %v1062_v42  ;;  %v1068_v39 = vshrl.u32 %v1499_v58, %v1062_v42  ;;  %v1067_v19 = vshll.u32 %v1498_v56, %v1061_v59 }
 0x163   : > { %v819_v50 = vxor.u32 2147483648, %v818_v25  ;;  %v1070_v21 = vshll.u32 %v1499_v58, %v1061_v59  ;;  %v1071_v0 = vshrl.u32 %v1500_v60, %v1062_v42  ;;  %v1073_v32 = vshll.u32 %v1500_v60, %v1061_v59 }
 0x164   : > { %v692_v44 = vadd.s32 536870912, %v691_v3  ;;  %v1066_v61 = vor.u32 %v1065_v18, %v1064_v6  ;;  %v1074_v9 = vshrl.u32 %v1501_v62, %v1062_v42  ;;  %v1069_v13 = vor.u32 %v1068_v39, %v1067_v19 }
 0x165   : > { %v820_v12 = vsel %vm737_vm1, %v819_v50, %v818_v25  ;;  %v1072_v48 = vor.u32 %v1071_v0, %v1070_v21  ;;  %v1077_v22 = vshrl.u32 %v1502_v5, %v1062_v42  ;;  %v1076_v37 = vshll.u32 %v1501_v62, %v1061_v59 }
 0x166   : > { %v823_v4 = vsel %vm1991_vm5, %v1622_v36, %v820_v12  ;;  %v2055_v34 = vshrl.u32 %v692_v44, 30  ;;  %v1075_v17 = vor.u32 %v1074_v9, %v1073_v32  ;;  %v828_v38 = vadd.s32 3, %v824_v55 }
 0x167   : > { %1412 = vcosq.f32 %v823_v4  ;;  %v1055_v40 = vor.u32 8388608, %v1054_v23  ;;  %vm1079_vm8 = vcmp.lt.s32.totalorder %v1060_v2, 1  ;;  %v1078_v24 = vor.u32 %v1077_v22, %v1076_v37 }
 0x168   : > { %1414 = vsinq.f32 %v823_v4  ;;  %v694_v33 = vshll.u32 %v2055_v34, 30  ;;  %vm1082_vm9 = vcmp.lt.s32.totalorder %v1060_v2, 4  ;;  %v1063_v7 = vshrl.u32 %v1497_v52, %v1062_v42 }
 0x169   : > { %vm1081_vm10 = vcmp.lt.s32.totalorder %v1060_v2, 3  ;;  %v1087_v45 = vsel %vm1079_vm8, %v1066_v61, %v1069_v13  ;;  %v1088_v16 = vsel %vm1082_vm9, %v1075_v17, 920167782  ;;  %vm1080_vm11 = vcmp.lt.s32.totalorder %v1060_v2, 2 }
 0x16a   : > { %v2062_v15 = vsub.s32 %v691_v3, %v694_v33  ;;  %v1084_v51 = vsel %vm1082_vm9, %v1072_v48, 2102212464  ;;  %v1089_v30 = vsel %vm1081_vm10, %v1072_v48, %v1088_v16  ;;  %v1091_v57 = vsel %vm1079_vm8, %v1069_v13, %v1072_v48 }
 0x16b   : > { %v1090_v10 = vsel %vm1080_vm11, %v1087_v45, %v1089_v30  ;;  %v1095_v35 = vshll.u32 %v1055_v40, 8  ;;  %v2070_v29 = vadd.f32 %v1595_v11, %v1619_v31  ;;  %v829_v47 = vand.u32 3, %v828_v38 }
 0x16c   : > { %v697_v53 = vsub.s32 0, %v2062_v15  ;;  %v1083_v59 = vsel %vm1079_vm8, %v1063_v7, %v1066_v61  ;;  %v1092_v8 = vsel %vm1082_vm9, %v1078_v24, 1326507024  ;;  %v1085_v54 = vsel %vm1081_vm10, %v1069_v13, %v1084_v51 }
 0x16d   : > { %v1093_v63 = vsel %vm1081_vm10, %v1075_v17, %v1092_v8  ;;  %v2077_v23 = vmul.u32.u64.low %v1095_v35, %v1090_v10  ;;  %v2078_v43 = vmul.u32.u64.high %v1095_v35, %v1090_v10, %v2077_v23  ;;  %vm827_vm12 = vweird.f32 %v1622_v36 }
 0x16e   : > { %v1264_v46 = vmin.u32 %v697_v53, %v2062_v15  ;;  %v1094_v11 = vsel %vm1080_vm11, %v1091_v57, %v1093_v63  ;;  %vm633_vm13 = vcmp.lt.s32.totalorder %v1887_v20, 0  ;;  %v530_v25 = vand.u32 2139095040, %v2070_v29 }
 0x16f   : > { %v2084_v31 = vmul.u32.u64.low %v1095_v35, %v1094_v11  ;;  %v2085_v42 = vmul.u32.u64.high %v1095_v35, %v1094_v11, %v2084_v31  ;;  %vm830_vm14 = vcmp.lt.s32.totalorder %v829_v47, 2  ;;  %v1086_v1 = vsel %vm1080_vm11, %v1083_v59, %v1085_v54 }
 0x170   : > { %v699_v55 = vclz %v1264_v46  ;;  %v527_v3 = vand.u32 2147483647, %v2070_v29  ;;  %vm831_vm15 = vcmp.eq.s32.totalorder %v829_v47, 0  ;;  %vm834_vm0 = vcmp.eq.s32.totalorder %v829_v47, 2 }
 0x171   : > { %v1413_v6 = vpop.eup %1412  ;;  %v1105_v18 = vadd.s32 1, %v2078_v43  ;;  %v531_v39 = vshrl.u32 %v530_v25, 23  ;;  %v687_v21 = vadd.s32 %v2007_v49, %v2014_v26  ;;  %v717_v44 = vsub.s32 4, %v2055_v34 }
 0x172   : > { %v1415_v50 = vpop.eup %1414  ;;  %v835_v19 = vxor.u32 2147483648, %v1413_v6  ;;  %v1265_v0 = vadd.s32 4294967294, %v699_v55  ;;  %v1102_v32 = vmul.u32 %v1095_v35, %v1086_v1  ;;  %vm1104_vm1 = vc.u32 %v2085_v42, %v2077_v23 }
 0x173   : > { %v832_v61 = vxor.u32 2147483648, %v1415_v50  ;;  %v1259_v2 = vadd.s32 4294967169, %v531_v39  ;;  %v1106_v12 = vsel %vm1104_vm1, %v1105_v18, %v2078_v43  ;;  %v534_v13 = vand.u32 8388607, %v527_v3 }
 0x174   : > { %v836_v9 = vsel %vm834_vm0, %v835_v19, %v1415_v50  ;;  %vm1266_vm2 = vcmp.lt.s32.totalorder %v1265_v0, 0  ;;  %v1107_v49 = vadd.s32 %v1106_v12, %v1102_v32  ;;  %v718_v38 = vsel %vm633_vm13, %v717_v44, %v2055_v34 }
 0x175   : > { %v833_v48 = vsel %vm831_vm15, %v1413_v6, %v832_v61  ;;  %v702_v22 = vsel %vm1266_vm2, 0, %v1265_v0  ;;  %v537_v26 = vadd.s32 1, %v1259_v2  ;;  %vm2107_vm3 = vcmp.le.f32.partialorder %v631_v14, 0.7853982 }
 0x176   : > { %v837_v4 = vsel %vm830_vm14, %v833_v48, %v836_v9  ;;  %v703_v17 = vsub.s32 32, %v702_v22  ;;  %v707_v37 = vsub.s32 4294967266, %v702_v22  ;;  %v1108_v24 = vadd.s32 536870912, %v1107_v49 }
 0x177   : > { %v838_v40 = vsel %vm827_vm12, nan, %v837_v4  ;;  %vm538_vm4 = vcmp.gt.s32.totalorder %v537_v26, 0  ;;  %v704_v7 = vshll.u32 %v2062_v15, %v702_v22  ;;  %v720_v34 = vsel %vm2107_vm3, 0, %v718_v38  ;;  %v1432_v15 = vld [vmem:[%s2307_s2] ss:$0 sm:$0xff] }
 0x178   : > { %1155 = vst [vmem:[%s1909_s10 + $0x20] sm:$0xff] %v838_v40  ;;  %v705_v45 = vshrl.u32 %v687_v21, %v703_v17  ;;  %v708_v16 = vadd.s32 127, %v707_v37  ;;  %v539_v51 = vsel %vm538_vm4, %v537_v26, 0  ;;  %v2115_v30 = vshrl.u32 %v1108_v24, 30 }
 0x179   : > { %v535_v36 = vor.u32 8388608, %v534_v13  ;;  %v541_v10 = vand.u32 31, %v539_v51  ;;  %v724_v59 = vadd.s32 3, %v720_v34  ;;  %v2122_v8 = vadd.f32 %v1432_v15, %v1625_v41 }
 0x17a   : > { %v706_v57 = vor.u32 %v705_v45, %v704_v7  ;;  %v709_v14 = vshll.u32 %v708_v16, 23  ;;  %v1110_v35 = vshll.u32 %v2115_v30, 30  ;;  %v1103_v54 = vadd.s32 %v2077_v23, %v2085_v42 }
 0x17b   : > { %v542_v47 = vsub.s32 32, %v541_v10  ;;  %v2128_v46 = vshll.u32 %v535_v36, 8  ;;  %v540_v6 = vshrl.u32 %v539_v51, 5  ;;  %v544_v41 = vshll.u32 %v1497_v52, %v541_v10 }
 0x17c   : > { %v710_v53 = vor.u32 4788187, %v709_v14  ;;  %v2125_v63 = vsub.s32 %v1107_v49, %v1110_v35  ;;  %v713_v31 = vcvt.s32.f32 %v706_v57  ;;  %v547_v18 = vshll.u32 %v1498_v56, %v541_v10 }
 0x17d   : > { %v545_v43 = vshrl.u32 %v1498_v56, %v542_v47  ;;  %v548_v25 = vshrl.u32 %v1499_v58, %v542_v47  ;;  %v551_v55 = vshrl.u32 %v1500_v60, %v542_v47  ;;  %v550_v42 = vshll.u32 %v1499_v58, %v541_v10 }
 0x17e   : > { %v711_v11 = vand.u32 2147483647, %v710_v53  ;;  %v1113_v1 = vsub.s32 0, %v2125_v63  ;;  %v553_v39 = vshll.u32 %v1500_v60, %v541_v10  ;;  %v554_v50 = vshrl.u32 %v1501_v62, %v542_v47 }
 0x17f   : > { %v546_v21 = vor.u32 %v545_v43, %v544_v41  ;;  %v549_v0 = vor.u32 %v548_v25, %v547_v18  ;;  %v557_v44 = vshrl.u32 %v1502_v5, %v542_v47  ;;  %v552_v32 = vor.u32 %v551_v55, %v550_v42 }
 0x180   : > { %v714_v23 = vmul.f32 %v713_v31, %v711_v11  ;;  %v1280_v19 = vmin.u32 %v1113_v1, %v2125_v63  ;;  %v555_v2 = vor.u32 %v554_v50, %v553_v39  ;;  %v556_v9 = vshll.u32 %v1501_v62, %v541_v10 }
 0x181   : > { %vm1049_vm5 = vcmp.lt.s32.totalorder %v1940_v28, 0  ;;  %v1133_v13 = vsub.s32 4, %v2115_v30  ;;  %v543_v48 = vshrl.u32 %v1497_v52, %v542_v47  ;;  %v946_v22 = vand.u32 2139095040, %v2122_v8 }
 0x182   : > { %v715_v61 = vxor.u32 2147483648, %v714_v23  ;;  %v1115_v12 = vclz %v1280_v19  ;;  %v558_v26 = vor.u32 %v557_v44, %v556_v9  ;;  %vm559_vm6 = vcmp.lt.s32.totalorder %v540_v6, 1 }
 0x183   : > { %vm560_vm7 = vcmp.lt.s32.totalorder %v540_v6, 2  ;;  %vm561_vm8 = vcmp.lt.s32.totalorder %v540_v6, 3  ;;  %vm562_vm9 = vcmp.lt.s32.totalorder %v540_v6, 4  ;;  %v567_v38 = vsel %vm559_vm6, %v546_v21, %v549_v0 }
 0x184   : > { %v716_v49 = vsel %vm633_vm13, %v715_v61, %v714_v23  ;;  %v1281_v17 = vadd.s32 4294967294, %v1115_v12  ;;  %v564_v37 = vsel %vm562_vm9, %v552_v32, 2102212464  ;;  %v568_v40 = vsel %vm562_vm9, %v555_v2, 920167782 }
 0x185   : > { %v719_v4 = vsel %vm2107_vm3, %v1887_v20, %v716_v49  ;;  %v563_v24 = vsel %vm559_vm6, %v543_v48, %v546_v21  ;;  %v569_v7 = vsel %vm561_vm8, %v552_v32, %v568_v40  ;;  %v571_v33 = vsel %vm559_vm6, %v549_v0, %v552_v32 }
 0x186   : > { %1416 = vcosq.f32 %v719_v4  ;;  %vm1282_vm10 = vcmp.lt.s32.totalorder %v1281_v17, 0  ;;  %v570_v16 = vsel %vm560_vm7, %v567_v38, %v569_v7  ;;  %v572_v51 = vsel %vm562_vm9, %v558_v26, 1326507024 }
 0x187   : > { %1418 = vsinq.f32 %v719_v4  ;;  %v1118_v45 = vsel %vm1282_vm10, 0, %v1281_v17  ;;  %v565_v10 = vsel %vm561_vm8, %v549_v0, %v564_v37  ;;  %v573_v57 = vsel %vm561_vm8, %v555_v2, %v572_v51 }
 0x188   : > { %v1119_v34 = vsub.s32 32, %v1118_v45  ;;  %v1123_v36 = vsub.s32 4294967266, %v1118_v45  ;;  %v1120_v14 = vshll.u32 %v2125_v63, %v1118_v45  ;;  %v574_v35 = vsel %vm560_vm7, %v571_v33, %v573_v57 }
 0x189   : > { %v2160_v47 = vmul.u32.u64.low %v2128_v46, %v570_v16  ;;  %v2161_v53 = vmul.u32.u64.high %v2128_v46, %v570_v16, %v2160_v47  ;;  %v2165_v11 = vmul.u32.u64.low %v2128_v46, %v574_v35  ;;  %v2166_v31 = vmul.u32.u64.high %v2128_v46, %v574_v35, %v2165_v11 }
 0x18a   : > { %v1121_v15 = vshrl.u32 %v1103_v54, %v1119_v34  ;;  %v1124_v43 = vadd.s32 127, %v1123_v36  ;;  %v725_v25 = vand.u32 3, %v724_v59  ;;  %v1134_v55 = vsel %vm1049_vm5, %v1133_v13, %v2115_v30 }
 0x18b   : > { %v566_v63 = vsel %vm560_vm7, %v563_v24, %v565_v10  ;;  %v947_v1 = vshrl.u32 %v946_v22, 23  ;;  %vm2174_vm11 = vcmp.le.f32.partialorder %v1047_v27, 0.7853982  ;;  %v585_v54 = vadd.s32 1, %v2161_v53 }
 0x18c   : > { %v1122_v41 = vor.u32 %v1121_v15, %v1120_v14  ;;  %v1125_v18 = vshll.u32 %v1124_v43, 23  ;;  %v943_v42 = vand.u32 2147483647, %v2122_v8  ;;  %v1136_v30 = vsel %vm2174_vm11, 0, %v1134_v55 }
 0x18d   : > { %v1275_v59 = vadd.s32 4294967169, %v947_v1  ;;  %v582_v6 = vmul.u32 %v2128_v46, %v566_v63  ;;  %vm584_vm12 = vc.u32 %v2166_v31, %v2160_v47  ;;  %vm727_vm13 = vcmp.eq.s32.totalorder %v725_v25, 0 }
 0x18e   : > { %v1126_v39 = vor.u32 4788187, %v1125_v18  ;;  %vm730_vm14 = vcmp.eq.s32.totalorder %v725_v25, 2  ;;  %v586_v27 = vsel %vm584_vm12, %v585_v54, %v2161_v53  ;;  %v1129_v61 = vcvt.s32.f32 %v1122_v41 }
 0x18f   : > { %v953_v19 = vadd.s32 1, %v1275_v59  ;;  %v587_v32 = vadd.s32 %v586_v27, %v582_v6  ;;  %v1140_v9 = vadd.s32 3, %v1136_v30  ;;  %v950_v12 = vand.u32 8388607, %v943_v42 }
 0x190   : > { %v1417_v50 = vpop.eup %1416  ;;  %v1127_v44 = vand.u32 2147483647, %v1126_v39  ;;  %vm726_vm0 = vcmp.lt.s32.totalorder %v725_v25, 2  ;;  %vm723_vm1 = vweird.f32 %v1887_v20  ;;  %v583_v41 = vadd.s32 %v2160_v47, %v2166_v31 }
 0x191   : > { %v1419_v21 = vpop.eup %1418  ;;  %v731_v0 = vxor.u32 2147483648, %v1417_v50  ;;  %vm954_vm15 = vcmp.gt.s32.totalorder %v953_v19, 0  ;;  %v588_v48 = vadd.s32 536870912, %v587_v32  ;;  %v2192_v40 = vand.u32 3, %v1140_v9 }
 0x192   : > { %v728_v2 = vxor.u32 2147483648, %v1419_v21  ;;  %v1130_v13 = vmul.f32 %v1129_v61, %v1127_v44  ;;  %v955_v22 = vsel %vm954_vm15, %v953_v19, 0  ;;  %v951_v16 = vor.u32 8388608, %v950_v12 }
 0x193   : > { %v732_v46 = vsel %vm730_vm14, %v731_v0, %v1419_v21  ;;  %v957_v26 = vand.u32 31, %v955_v22  ;;  %v2190_v37 = vshrl.u32 %v588_v48, 30  ;;  %v956_v35 = vshrl.u32 %v955_v22, 5 }
 0x194   : > { %v729_v49 = vsel %vm727_vm13, %v1417_v50, %v728_v2  ;;  %v1131_v17 = vxor.u32 2147483648, %v1130_v13  ;;  %vm1146_vm2 = vcmp.eq.s32.totalorder %v2192_v40, 2  ;;  %v991_v1 = vshll.u32 %v951_v16, 8 }
 0x195   : > { %v733_v4 = vsel %vm726_vm0, %v729_v49, %v732_v46  ;;  %v958_v24 = vsub.s32 32, %v957_v26  ;;  %v590_v45 = vshll.u32 %v2190_v37, 30  ;;  %v960_v33 = vshll.u32 %v1497_v52, %v957_v26 }
 0x196   : > { %v734_v38 = vsel %vm723_vm1, nan, %v733_v4  ;;  %v1132_v7 = vsel %vm1049_vm5, %v1131_v17, %v1130_v13  ;;  %v963_v34 = vshll.u32 %v1498_v56, %v957_v26  ;;  %v966_v57 = vshll.u32 %v1499_v58, %v957_v26 }
 0x197   : > { %1154 = vst [vmem:[%s1909_s10 + $0x18] sm:$0xff] %v734_v38  ;;  %v1135_v20 = vsel %vm2174_vm11, %v1940_v28, %v1132_v7  ;;  %v961_v51 = vshrl.u32 %v1498_v56, %v958_v24  ;;  %v964_v36 = vshrl.u32 %v1499_v58, %v958_v24  ;;  %v2205_v10 = vsub.s32 %v587_v32, %v590_v45 }
 0x198   : > { %1420 = vcosq.f32 %v1135_v20  ;;  %v967_v14 = vshrl.u32 %v1500_v60, %v958_v24  ;;  %v969_v25 = vshll.u32 %v1500_v60, %v957_v26  ;;  %v970_v56 = vshrl.u32 %v1501_v62, %v958_v24 }
 0x199   : > { %1422 = vsinq.f32 %v1135_v20  ;;  %v593_v53 = vsub.s32 0, %v2205_v10  ;;  %v962_v15 = vor.u32 %v961_v51, %v960_v33  ;;  %v965_v43 = vor.u32 %v964_v36, %v963_v34 }
 0x19a   : > { %v968_v11 = vor.u32 %v967_v14, %v966_v57  ;;  %v972_v55 = vshll.u32 %v1501_v62, %v957_v26  ;;  %v973_v63 = vshrl.u32 %v1502_v5, %v958_v24  ;;  %v959_v18 = vshrl.u32 %v1497_v52, %v958_v24 }
 0x19b   : > { %v1260_v58 = vmin.u32 %v593_v53, %v2205_v10  ;;  %v971_v23 = vor.u32 %v970_v56, %v969_v25  ;;  %vm975_vm3 = vcmp.lt.s32.totalorder %v956_v35, 1  ;;  %vm977_vm4 = vcmp.lt.s32.totalorder %v956_v35, 3 }
 0x19c   : > { %v974_v54 = vor.u32 %v973_v63, %v972_v55  ;;  %vm978_vm5 = vcmp.lt.s32.totalorder %v956_v35, 4  ;;  %v983_v62 = vsel %vm975_vm3, %v962_v15, %v965_v43  ;;  %v987_v5 = vsel %vm975_vm3, %v965_v43, %v968_v11 }
 0x19d   : > { %v595_v59 = vclz %v1260_v58  ;;  %v980_v60 = vsel %vm978_vm5, %v968_v11, 2102212464  ;;  %v984_v39 = vsel %vm978_vm5, %v971_v23, 920167782  ;;  %vm976_vm6 = vcmp.lt.s32.totalorder %v956_v35, 2 }
 0x19e   : > { %v985_v6 = vsel %vm977_vm4, %v968_v11, %v984_v39  ;;  %v988_v50 = vsel %vm978_vm5, %v974_v54, 1326507024  ;;  %v979_v27 = vsel %vm975_vm3, %v959_v18, %v962_v15  ;;  %v981_v19 = vsel %vm977_vm4, %v965_v43, %v980_v60 }
 0x19f   : > { %v1261_v30 = vadd.s32 4294967294, %v595_v59  ;;  %v986_v47 = vsel %vm976_vm6, %v983_v62, %v985_v6  ;;  %v989_v31 = vsel %vm977_vm4, %v971_v23, %v988_v50  ;;  %v982_v22 = vsel %vm976_vm6, %v979_v27, %v981_v19 }
 0x1a0   : > { %v990_v21 = vsel %vm976_vm6, %v987_v5, %v989_v31  ;;  %v2221_v0 = vmul.u32.u64.low %v991_v1, %v986_v47  ;;  %v2222_v44 = vmul.u32.u64.high %v991_v1, %v986_v47, %v2221_v0  ;;  %vm1142_vm8 = vcmp.lt.s32.totalorder %v2192_v40, 2 }
 0x1a1   : > { %vm1262_vm7 = vcmp.lt.s32.totalorder %v1261_v30, 0  ;;  %v2224_v9 = vmul.u32.u64.low %v991_v1, %v990_v21  ;;  %v2225_v12 = vmul.u32.u64.high %v991_v1, %v990_v21, %v2224_v9  ;;  %vm1143_vm9 = vcmp.eq.s32.totalorder %v2192_v40, 0 }
 0x1a2   : > { %v1421_v52 = vpop.eup %1420  ;;  %v598_v2 = vsel %vm1262_vm7, 0, %v1261_v30  ;;  %v1001_v24 = vadd.s32 1, %v2222_v44  ;;  %vm1139_vm10 = vweird.f32 %v1940_v28  ;;  %v998_v45 = vmul.u32 %v991_v1, %v982_v22 }
 0x1a3   : > { %v1423_v61 = vpop.eup %1422  ;;  %v1147_v32 = vxor.u32 2147483648, %v1421_v52  ;;  %v599_v13 = vsub.s32 32, %v598_v2  ;;  %v603_v48 = vsub.s32 4294967266, %v598_v2  ;;  %v600_v26 = vshll.u32 %v2205_v10, %v598_v2 }
 0x1a4   : > { %v1144_v46 = vxor.u32 2147483648, %v1423_v61  ;;  %vm1000_vm11 = vc.u32 %v2225_v12, %v2221_v0  ;;  %v613_v53 = vsub.s32 4, %v2190_v37  ;;  %vm529_vm12 = vcmp.lt.s32.totalorder %v2070_v29, 0 }
 0x1a5   : > { %v1148_v49 = vsel %vm1146_vm2, %v1147_v32, %v1423_v61  ;;  %v601_v17 = vshrl.u32 %v583_v41, %v599_v13  ;;  %v604_v38 = vadd.s32 127, %v603_v48  ;;  %v1002_v51 = vsel %vm1000_vm11, %v1001_v24, %v2222_v44 }
 0x1a6   : > { %v1145_v4 = vsel %vm1143_vm9, %v1421_v52, %v1144_v46  ;;  %v1003_v40 = vadd.s32 %v1002_v51, %v998_v45  ;;  %vm528_vm13 = vcmp.le.f32.partialorder %v527_v3, 0.7853982  ;;  %v614_v25 = vsel %vm529_vm12, %v613_v53, %v2190_v37 }
 0x1a7   : > { %v1149_v7 = vsel %vm1142_vm8, %v1145_v4, %v1148_v49  ;;  %v602_v33 = vor.u32 %v601_v17, %v600_v26  ;;  %v605_v20 = vshll.u32 %v604_v38, 23  ;;  %v616_v63 = vsel %vm528_vm13, 0, %v614_v25 }
 0x1a8   : > { %v1150_v16 = vsel %vm1139_vm10, nan, %v1149_v7  ;;  %v1004_v36 = vadd.s32 536870912, %v1003_v40  ;;  %v620_v41 = vadd.s32 3, %v616_v63  ;;  %v999_v59 = vadd.s32 %v2221_v0, %v2225_v12 }
 0x1a9   : > { %1158 = vst [vmem:[%s1909_s10 + $0x38] sm:$0xff] %v1150_v16  ;;  %v606_v34 = vor.u32 4788187, %v605_v20  ;;  %v609_v57 = vcvt.s32.f32 %v602_v33  ;;  %vm619_vm2 = vweird.f32 %v2070_v29  ;;  %vm945_vm3 = vcmp.lt.s32.totalorder %v2122_v8, 0 }
 0x1aa   : > { %v1005_v14 = vshrl.u32 %v1004_v36, 30  ;;  %v621_v23 = vand.u32 3, %v620_v41  ;;  %vm944_vm4 = vcmp.le.f32.partialorder %v943_v42, 0.7853982  ;;  %vm1035_vm8 = vweird.f32 %v2122_v8 }
 0x1ab   : > { %v607_v10 = vand.u32 2147483647, %v606_v34 }
 0x1ac   : > { %v1006_v28 = vshll.u32 %v1005_v14, 30  ;;  %vm626_vm15 = vcmp.eq.s32.totalorder %v621_v23, 2  ;;  %vm623_vm0 = vcmp.eq.s32.totalorder %v621_v23, 0  ;;  %vm622_vm1 = vcmp.lt.s32.totalorder %v621_v23, 2 }
 0x1ad   : > { %v610_v35 = vmul.f32 %v609_v57, %v607_v10  ;;  %v1029_v2 = vsub.s32 4, %v1005_v14 }
 0x1ae   : > { %v1007_v43 = vsub.s32 %v1003_v40, %v1006_v28 }
 0x1af   : > { %v611_v15 = vxor.u32 2147483648, %v610_v35  ;;  %v1030_v46 = vsel %vm945_vm3, %v1029_v2, %v1005_v14 }
 0x1b0   : > { %v1009_v55 = vsub.s32 0, %v1007_v43  ;;  %v1032_v13 = vsel %vm944_vm4, 0, %v1030_v46 }
 0x1b1   : > { %v612_v11 = vsel %vm529_vm12, %v611_v15, %v610_v35  ;;  %v1036_v48 = vadd.s32 3, %v1032_v13 }
 0x1b2   : > { %v615_v56 = vsel %vm528_vm13, %v2070_v29, %v612_v11  ;;  %v1276_v58 = vmin.u32 %v1009_v55, %v1007_v43 }
 0x1b3   : > { %1424 = vcosq.f32 %v615_v56  ;;  %v1037_v22 = vand.u32 3, %v1036_v48 }
 0x1b4   : > { %1426 = vsinq.f32 %v615_v56  ;;  %v1011_v1 = vclz %v1276_v58 }
 0x1b5   : > { %vm1042_vm5 = vcmp.eq.s32.totalorder %v1037_v22, 2  ;;  %vm1039_vm6 = vcmp.eq.s32.totalorder %v1037_v22, 0  ;;  %vm1038_vm7 = vcmp.lt.s32.totalorder %v1037_v22, 2 }
 0x1b6   : > { %v1277_v18 = vadd.s32 4294967294, %v1011_v1 }
 0x1b8   : > { %vm1278_vm14 = vcmp.lt.s32.totalorder %v1277_v18, 0 }
 0x1b9   : > { %v1014_v54 = vsel %vm1278_vm14, 0, %v1277_v18 }
 0x1ba   : > { %v1015_v60 = vsub.s32 32, %v1014_v54  ;;  %v1019_v3 = vsub.s32 4294967266, %v1014_v54  ;;  %v1016_v5 = vshll.u32 %v1007_v43, %v1014_v54 }
 0x1bc   : > { %v1017_v30 = vshrl.u32 %v999_v59, %v1015_v60  ;;  %v1020_v6 = vadd.s32 127, %v1019_v3 }
 0x1bd   : > { %v1425_v62 = vpop.eup %1424 }
 0x1be   : > { %v1427_v39 = vpop.eup %1426  ;;  %v627_v37 = vxor.u32 2147483648, %v1425_v62  ;;  %v1018_v19 = vor.u32 %v1017_v30, %v1016_v5  ;;  %v1021_v47 = vshll.u32 %v1020_v6, 23 }
 0x1bf   : > { %v624_v50 = vxor.u32 2147483648, %v1427_v39 }
 0x1c0   : > { %v628_v27 = vsel %vm626_vm15, %v627_v37, %v1427_v39  ;;  %v1022_v21 = vor.u32 4788187, %v1021_v47  ;;  %v1025_v61 = vcvt.s32.f32 %v1018_v19 }
 0x1c1   : > { %v625_v31 = vsel %vm623_vm0, %v1425_v62, %v624_v50 }
 0x1c2   : > { %v629_v52 = vsel %vm622_vm1, %v625_v31, %v628_v27  ;;  %v1023_v44 = vand.u32 2147483647, %v1022_v21 }
 0x1c3   : > { %v630_v0 = vsel %vm619_vm2, nan, %v629_v52 }
 0x1c4   : > { %1153 = vst [vmem:[%s1909_s10 + $0x10] sm:$0xff] %v630_v0  ;;  %v1026_v32 = vmul.f32 %v1025_v61, %v1023_v44 }
 0x1c6   : > { %v1027_v9 = vxor.u32 2147483648, %v1026_v32 }
 0x1c8   : > { %v1028_v12 = vsel %vm945_vm3, %v1027_v9, %v1026_v32 }
 0x1c9   : > { %v1031_v29 = vsel %vm944_vm4, %v2122_v8, %v1028_v12 }
 0x1ca   : > { %1428 = vcosq.f32 %v1031_v29 }
 0x1cb   : > { %1430 = vsinq.f32 %v1031_v29 }
 0x1d4   : > { %v1429_v49 = vpop.eup %1428 }
 0x1d5   : > { %v1431_v26 = vpop.eup %1430  ;;  %v1043_v4 = vxor.u32 2147483648, %v1429_v49 }
 0x1d6   : > { %v1040_v17 = vxor.u32 2147483648, %v1431_v26 }
 0x1d7   : > { %v1044_v42 = vsel %vm1042_vm5, %v1043_v4, %v1431_v26 }
 0x1d8   : > { %v1041_v38 = vsel %vm1039_vm6, %v1429_v49, %v1040_v17 }
 0x1d9   : > { %v1045_v24 = vsel %vm1038_vm7, %v1041_v38, %v1044_v42 }
 0x1da   : > { %v1046_v7 = vsel %vm1035_vm8, nan, %v1045_v24 }
 0x1db   : > { %1157 = vst [vmem:[%s1909_s10 + $0x30] sm:$0xff] %v1046_v7 }
 0x1dc   : > { %1446 = shalt.err (!%p1443_p3)
}
 0x1dd   : > { %s1447_s4 = scalar_lea.hbm %s2256_s26, 1024  ;;  %s1451_s7 = scalar_lea.hbm %s2308_s3, 4096 }
 0x1de   : > { %p1448_p4 = scmp.ne.s32.totalorder %s2256_s26, %s1447_s4  ;;  %p1452_p9 = scmp.lt.u32.totalorder %s2256_s26, %s2308_s3 }
 0x1df   : > { %p1453_p10 = scmp.lt.u32.totalorder %s1451_s7, %s1447_s4  ;;  %p1455_p12 = scmp.lt.u32.totalorder %s1447_s4, %s2256_s26 }
 0x1e0   : > { %p1449_p7 = pnand %p1448_p4, %p1564_p5 }
 0x1e1   : > { %p1454_p11 = por %p1453_p10, %p1452_p9 }
 0x1e2   : > { %p1450_p8 = pneg %p1449_p7 }
 0x1e3   : > { %p1456_p13 = por %p1455_p12, %p1454_p11 }
 0x1e5   : > { %p1457_p0 = pnand %p1456_p13, %p1450_p8 }
 0x1e7   : > { %1460 = shalt.err (!%p1457_p0)
}
 0x1e8   : > { %s1504_s10 = smov 128   ;;  %s1505_s11 = smov 8  }
 0x1e9   : > { %1353 = dma.vmem_to_hbm [thread:$0]  (%p1564_p5), %s2258_s20, 1024, %s2256_s26, %s2264_s16, %s1504_s10, %s1504_s10, %s1505_s11  }
 0x1ea PF: > { %p1359_p1 = scmp.ge.s32.totalorder %s1495_s15, 2  ;;  %s1188_s17 = sand.u32 1, %s1483_s12  }
 0x1eb   : > { %s1189_s19 = scalar_lea.sflag [#allocation3], %s1188_s17 }
 0x1ec   : > { %p1356_p2 = pnand %p1359_p1, %p1568_p6 }
 0x1ee   : > { %1478 = dma.done.wait (!%p1356_p2), %s1189_s19, 1024  }
 0x1ef   : > { %1480 = vsyncadd (!%p1356_p2), %s1189_s19, 4294966272  ;;  %p13_p3 = scmp.ge.s32.totalorder %s1551_s18, 6   ;;  %s2323_s12 = smov %s1487_s13 }
 0x1f0   : > { %s2324_s13 = smov %s1491_s14  ;;  %s2325_s14 = smov %s1562_s21 }
 0x1f1   : > { %s2326_s15 = smov %s1551_s18  ;;  %15 = sbr.rel (!%p13_p3) target bundleno = 3 (0x3), region = 67 }
 0x1f8   :  { %1194 = vsyncpa [#allocation3], 1 }
 0x1f9   :  { %1196 = vsyncpa [#allocation3 + $0x1], 1 }

</bundles_post_ra>
